<compile_context>
chip_gen: v7x
topology: tpu7x:2x2x1
jax: 0.10.0
libtpu: 0.0.40
codegen_flags: <defaults>
</compile_context>

<pallas_src>
import math

import jax
import jax.numpy as jnp
from jax.experimental import pallas as pl
from jax.experimental.pallas import tpu as pltpu


def _vmem_capacity_bytes():
    """Best-effort physical VMEM query; conservative (v7x, 64 MiB) fallback."""
    try:
        info = pltpu.get_tpu_info()
        for name in ("vmem_capacity_bytes", "vmem_size_bytes", "vmem_bytes"):
            cap = getattr(info, name, None)
            if cap:
                return int(cap)
    except Exception:
        pass
    return 64 * 1024 * 1024


def _make_kernel(g, inv_c, eps):
    highest = jax.lax.Precision.HIGHEST

    if g > 1:
        def kernel(x_ref, w_ref, s_ref, st_ref, o_ref):
            xv = x_ref[...].astype(jnp.float32)                       # (tm, Cp)
            s = s_ref[...]                                            # (Cp, g)
            st = st_ref[...]                                          # (g, Cp)
            # Per-original-row sums on the (otherwise idle) MXU.
            s1 = jnp.dot(xv, s, precision=highest,
                         preferred_element_type=jnp.float32)          # (tm, g)
            mean = s1 * inv_c
            mean_full = jnp.dot(mean, st, precision=highest,
                                preferred_element_type=jnp.float32)   # (tm, Cp)
            xc = xv - mean_full                                       # centered copy
            s2 = jnp.dot(xc * xc, s, precision=highest,
                         preferred_element_type=jnp.float32)          # (tm, g)
            inv = jax.lax.rsqrt(s2 * inv_c + eps)                     # EUP slot
            inv_full = jnp.dot(inv, st, precision=highest,
                               preferred_element_type=jnp.float32)    # (tm, Cp)
            o_ref[...] = (xv * inv_full * w_ref[...]).astype(o_ref.dtype)
        return kernel

    def kernel(x_ref, w_ref, s_ref, o_ref):
        xv = x_ref[...].astype(jnp.float32)                           # (tm, C)
        s = s_ref[...]                                                # (C, 1)
        s1 = jnp.dot(xv, s, precision=highest,
                     preferred_element_type=jnp.float32)              # (tm, 1)
        mean = s1 * inv_c
        xc = xv - mean                                                # VPU broadcast
        s2 = jnp.dot(xc * xc, s, precision=highest,
                     preferred_element_type=jnp.float32)              # (tm, 1)
        inv = jax.lax.rsqrt(s2 * inv_c + eps)                         # (tm, 1)
        o_ref[...] = (xv * inv * w_ref[...]).astype(o_ref.dtype)
    return kernel


def biasfree_layernorm(x, weight, *, eps=1e-5, target_f32_block_bytes=None):
    """x: (..., C), weight: (C,). Normalizes over the last axis (biased var)."""
    orig_shape = x.shape
    C = orig_shape[-1]
    assert weight.shape == (C,)

    N = 1
    for d in orig_shape[:-1]:
        N *= int(d)
    if N == 0:
        return x

    # ---- lane packing: g consecutive rows per packed row, Cp lane-dense.
    g_ideal = 128 // math.gcd(C, 128)          # power of two
    g = math.gcd(g_ideal, N)                   # must divide N (no padding ever)
    Cp = g * C
    n_rows = N // g

    itemsize = jnp.dtype(x.dtype).itemsize
    row_align = {4: 8, 2: 16, 1: 32}.get(itemsize, 8)

    vmem_cap = _vmem_capacity_bytes()
    big_vmem = vmem_cap >= 100 * 1024 * 1024   # v5e / v6e (128 MiB physical)
    if target_f32_block_bytes is None:
        target_f32_block_bytes = (8 if big_vmem else 4) * 1024 * 1024
    budget_cap = (96 if big_vmem else 48) * 1024 * 1024

    # ---- row-tile size: target f32 working-set bytes, dtype-aligned rows.
    tm = max(row_align,
             (target_f32_block_bytes // (Cp * 4)) // row_align * row_align)
    n_rows_al = pl.cdiv(n_rows, row_align) * row_align
    tm = min(tm, n_rows_al)
    grid_m = pl.cdiv(n_rows, tm)

    # Keep the 'parallel' grid balanced across v7x's two TensorCores.
    if grid_m == 1 and n_rows > row_align:
        tm = max(row_align, pl.cdiv(pl.cdiv(n_rows, 2), row_align) * row_align)
        grid_m = pl.cdiv(n_rows, tm)
    elif 1 < grid_m < 8 and grid_m % 2 == 1:
        tgt = grid_m + 1
        tm = max(row_align, pl.cdiv(pl.cdiv(n_rows, tgt), row_align) * row_align)
        grid_m = pl.cdiv(n_rows, tm)

    xp = x.reshape(n_rows, Cp)                 # flat reshape; no pad / copy ops

    # Resident constants (constant index_map -> fetched once, kept in VMEM).
    w2 = jnp.tile(weight.astype(jnp.float32), g).reshape(1, Cp)
    group = jnp.arange(Cp, dtype=jnp.int32) // C                       # lane -> group
    S = (group[:, None] == jnp.arange(g, dtype=jnp.int32)[None, :]).astype(
        jnp.float32)                                                   # (Cp, g)

    inv_c = float(1.0 / C)
    kernel = _make_kernel(g, inv_c, eps)

    in_arrays = [xp, w2, S]
    in_specs = [
        pl.BlockSpec((tm, Cp), lambda i: (i, 0)),    # x rows, tiled (ragged tail OK)
        pl.BlockSpec((1, Cp), lambda i: (0, 0)),     # packed weight
        pl.BlockSpec((Cp, g), lambda i: (0, 0)),     # group-sum matrix
    ]
    if g > 1:
        ST = jnp.asarray(S.T)                        # (g, Cp) broadcast-back matrix
        in_arrays.append(ST)
        in_specs.append(pl.BlockSpec((g, Cp), lambda i: (0, 0)))

    io_block = tm * Cp * itemsize
    f32_block = tm * Cp * 4
    vmem_limit = int(min(budget_cap,
                         max(32 * 1024 * 1024, 4 * io_block + 6 * f32_block)))

    out = pl.pallas_call(
        kernel,
        out_shape=jax.ShapeDtypeStruct((n_rows, Cp), x.dtype),
        grid_spec=pltpu.PrefetchScalarGridSpec(
            num_scalar_prefetch=0,
            grid=(grid_m,),
            in_specs=in_specs,
            out_specs=pl.BlockSpec((tm, Cp), lambda i: (i, 0)),
        ),
        compiler_params=pltpu.CompilerParams(
            dimension_semantics=("parallel",),
            vmem_limit_bytes=vmem_limit,
        ),
    )(*in_arrays)

    return out.reshape(orig_shape)


if __name__ == "__main__":
    key = jax.random.PRNGKey(0)
    k0, k1, k2, k3, k4 = jax.random.split(key, 5)

    def ref(x, w):
        sigma = jnp.var(x, axis=-1, keepdims=True)
        return x / jnp.sqrt(sigma + 1e-5) * w

    # 1) TPMNet token layout (B, H*W, C); C=32 exercises lane packing (g=4).
    x1 = jax.random.normal(k0, (2, 64, 32), dtype=jnp.float32)
    w1 = jnp.ones((32,), dtype=jnp.float32)            # module init: weight = ones
    y1 = jax.block_until_ready(biasfree_layernorm(x1, w1))
    assert y1.shape == x1.shape
    assert jnp.allclose(y1, ref(x1, w1), atol=1e-4, rtol=1e-4), "C=32 mismatch"

    # 2) Odd row count (N=21) with C=48 -> g falls back to 1; ragged last
    #    row tile is handled in-kernel (no pad, no output slice).
    x2 = jax.random.normal(k1, (3, 7, 48), dtype=jnp.float32)
    w2 = 1.0 + 0.1 * jax.random.normal(k2, (48,), dtype=jnp.float32)
    y2 = jax.block_until_ready(biasfree_layernorm(x2, w2))
    assert jnp.allclose(y2, ref(x2, w2), atol=1e-4, rtol=1e-4), "C=48 mismatch"

    # 3) Ragged packed-row tiling with g>1 (N=400 rows -> 2 uneven tiles).
    x3 = jax.random.normal(k3, (2, 200, 32), dtype=jnp.float32)
    y3 = jax.block_until_ready(biasfree_layernorm(x3, w1))
    assert jnp.allclose(y3, ref(x3, w1), atol=1e-4, rtol=1e-4), "ragged mismatch"

    # 4) Large-mean data: exercises the centered two-pass variance numerics.
    x4 = 100.0 + jax.random.normal(k4, (2, 32, 64), dtype=jnp.float32)
    w4 = jnp.ones((64,), dtype=jnp.float32)
    y4 = jax.block_until_ready(biasfree_layernorm(x4, w4))
    assert jnp.allclose(y4, ref(x4, w4), atol=2e-3, rtol=2e-3), "large-mean mismatch"

    print("KERNEL_OK")
</pallas_src>

<mosaic_0001>
module attributes {stable_mosaic.version = 11 : i64} {
  func.func @kernel(%arg0: i32, %arg1: memref<16x128xf32, #tpu.memory_space<vmem>>, %arg2: memref<1x128xf32, #tpu.memory_space<vmem>>, %arg3: memref<128x4xf32, #tpu.memory_space<vmem>>, %arg4: memref<4x128xf32, #tpu.memory_space<vmem>>, %arg5: memref<16x128xf32, #tpu.memory_space<vmem>>) attributes {dimension_semantics = [#tpu.dimension_semantics<parallel>], iteration_bounds = array<i64: 2>, scalar_prefetch = 0 : i64, scratch_operands = 0 : i64, tpu.core_type = #tpu.core_type<tc>, window_params = [{transform_indices = @transform_0, window_bounds = array<i64: 16, 128>}, {pipeline_mode = #tpu.pipeline_mode<synchronous>, transform_indices = @transform_1, window_bounds = array<i64: 1, 128>}, {pipeline_mode = #tpu.pipeline_mode<synchronous>, transform_indices = @transform_2, window_bounds = array<i64: 128, 4>}, {pipeline_mode = #tpu.pipeline_mode<synchronous>, transform_indices = @transform_3, window_bounds = array<i64: 4, 128>}, {transform_indices = @transform_4, window_bounds = array<i64: 16, 128>}]} {
    %c0 = arith.constant 0 : index
    %c0_0 = arith.constant 0 : index
    %0 = vector.load %arg1[%c0, %c0_0] : memref<16x128xf32, #tpu.memory_space<vmem>>, vector<16x128xf32>
    %c0_1 = arith.constant 0 : index
    %c0_2 = arith.constant 0 : index
    %1 = vector.load %arg3[%c0_1, %c0_2] : memref<128x4xf32, #tpu.memory_space<vmem>>, vector<128x4xf32>
    %c0_3 = arith.constant 0 : index
    %c0_4 = arith.constant 0 : index
    %2 = vector.load %arg4[%c0_3, %c0_4] : memref<4x128xf32, #tpu.memory_space<vmem>>, vector<4x128xf32>
    %cst = arith.constant dense<0.000000e+00> : vector<16x4xf32>
    %3 = tpu.matmul %0, %1, %cst {dimension_numbers = #tpu.dot_dimension_numbers<[1], [0], [0], [1], [0, 0, 1, 1], [], []>, precision = #tpu.contract_precision<fp32>} : vector<16x128xf32>, vector<128x4xf32>, vector<16x4xf32> -> vector<16x4xf32>
    %cst_5 = arith.constant 3.125000e-02 : f32
    %4 = vector.broadcast %cst_5 : f32 to vector<16x4xf32>
    %5 = arith.mulf %3, %4 : vector<16x4xf32>
    %cst_6 = arith.constant dense<0.000000e+00> : vector<16x128xf32>
    %6 = tpu.matmul %5, %2, %cst_6 {dimension_numbers = #tpu.dot_dimension_numbers<[1], [0], [0], [1], [0, 0, 1, 1], [], []>, precision = #tpu.contract_precision<fp32>} : vector<16x4xf32>, vector<4x128xf32>, vector<16x128xf32> -> vector<16x128xf32>
    %7 = arith.subf %0, %6 : vector<16x128xf32>
    %8 = arith.mulf %7, %7 : vector<16x128xf32>
    %cst_7 = arith.constant dense<0.000000e+00> : vector<16x4xf32>
    %9 = tpu.matmul %8, %1, %cst_7 {dimension_numbers = #tpu.dot_dimension_numbers<[1], [0], [0], [1], [0, 0, 1, 1], [], []>, precision = #tpu.contract_precision<fp32>} : vector<16x128xf32>, vector<128x4xf32>, vector<16x4xf32> -> vector<16x4xf32>
    %cst_8 = arith.constant 3.125000e-02 : f32
    %10 = vector.broadcast %cst_8 : f32 to vector<16x4xf32>
    %11 = arith.mulf %9, %10 : vector<16x4xf32>
    %cst_9 = arith.constant 9.99999974E-6 : f32
    %12 = vector.broadcast %cst_9 : f32 to vector<16x4xf32>
    %13 = arith.addf %11, %12 : vector<16x4xf32>
    %14 = math.rsqrt %13 : vector<16x4xf32>
    %cst_10 = arith.constant dense<0.000000e+00> : vector<16x128xf32>
    %15 = tpu.matmul %14, %2, %cst_10 {dimension_numbers = #tpu.dot_dimension_numbers<[1], [0], [0], [1], [0, 0, 1, 1], [], []>, precision = #tpu.contract_precision<fp32>} : vector<16x4xf32>, vector<4x128xf32>, vector<16x128xf32> -> vector<16x128xf32>
    %16 = arith.mulf %0, %15 : vector<16x128xf32>
    %c0_11 = arith.constant 0 : index
    %c0_12 = arith.constant 0 : index
    %17 = vector.load %arg2[%c0_11, %c0_12] : memref<1x128xf32, #tpu.memory_space<vmem>>, vector<1x128xf32>
    %18 = vector.broadcast %17 : vector<1x128xf32> to vector<16x128xf32>
    %19 = arith.mulf %16, %18 : vector<16x128xf32>
    %c0_13 = arith.constant 0 : index
    %c0_14 = arith.constant 0 : index
    %20 = vector.load %arg5[%c0_13, %c0_14] : memref<16x128xf32, #tpu.memory_space<vmem>>, vector<16x128xf32>
    tpu.vector_store %arg5[%c0_13, %c0_14], %19 {strides = array<i32>} : memref<16x128xf32, #tpu.memory_space<vmem>>, vector<16x128xf32>,
    return
  }
  func.func @transform_0(%arg0: i32) -> (i32, i32) {
    %c0_i32 = arith.constant 0 : i32
    %c0_i32_0 = arith.constant 0 : i32
    return %arg0, %c0_i32 : i32, i32
  }
  func.func @transform_1(%arg0: i32) -> (i32, i32) {
    %c0_i32 = arith.constant 0 : i32
    %c0_i32_0 = arith.constant 0 : i32
    %c0_i32_1 = arith.constant 0 : i32
    return %c0_i32, %c0_i32_0 : i32, i32
  }
  func.func @transform_2(%arg0: i32) -> (i32, i32) {
    %c0_i32 = arith.constant 0 : i32
    %c0_i32_0 = arith.constant 0 : i32
    %c0_i32_1 = arith.constant 0 : i32
    return %c0_i32, %c0_i32_0 : i32, i32
  }
  func.func @transform_3(%arg0: i32) -> (i32, i32) {
    %c0_i32 = arith.constant 0 : i32
    %c0_i32_0 = arith.constant 0 : i32
    %c0_i32_1 = arith.constant 0 : i32
    return %c0_i32, %c0_i32_0 : i32, i32
  }
  func.func @transform_4(%arg0: i32) -> (i32, i32) {
    %c0_i32 = arith.constant 0 : i32
    %c0_i32_0 = arith.constant 0 : i32
    return %arg0, %c0_i32 : i32, i32
  }
}

</mosaic_0001>

<bundles_post_ra>
// kernel: tpu_custom_call.1
= control target key start
LH: loop header
LB: loop body
LE: loop exit
PB: predicated region body
PF: predicated region fallthrough
CT: control target
= control target key end

     0   :  { %9 = vsyncpa [#allocation3], 0  ;;  %s4584_s0 = inlined_call_operand.vmem [shape: f32[32,128], index: 0, kind: input, shape index: {}]   ;;  %s4585_s1 = inlined_call_operand.vmem [shape: f32[1,128], index: 1, kind: input, shape index: {}]   ;;  %s4586_s2 = inlined_call_operand.vmem [shape: f32[128,4], index: 2, kind: input, shape index: {}]   ;;  %s4587_s3 = inlined_call_operand.vmem [shape: f32[4,128], index: 3, kind: input, shape index: {}]   ;;  %s4588_s4 = inlined_call_operand.hbm [shape: f32[32,128], index: 4, kind: output, shape index: {}]  }
   0x1   :  { %11 = vsyncpa [#allocation3 + $0x1], 0  ;;  %s3989_s15 = smov 0   ;;  %s3991_s16 = smov 0  }
   0x2   :  { %s3993_s17 = smov 0   ;;  %s3995_s18 = smov 0  }
   0x3 LB: > { %s4010_s19 = sadd.s32 4294967295, %s3959_s18   ;;  %s2682_s20 = sadd.s32 4294967294, %s3959_s18   ;;  %s3959_s18 = sphi %s3995_s18, %s4594_s18   ;;  %s3955_s17 = sphi %s3993_s17, %s4593_s17   ;;  %s3951_s16 = sphi %s3991_s16, %s4592_s16   ;;  %s3947_s15 = sphi %s3989_s15, %s4591_s15  }
   0x4   : > { %s4014_s21 = sadd.s32 1, %s3959_s18   ;;  %s113_s22 = sadd.s32 1, %s3955_s17 }
   0x5   : > { %s110_s23 = ssub.s32 %s3959_s18, %s4014_s21  ;;  %p123_p0 = scmp.ne.s32.totalorder %s3955_s17, %s3951_s16 }
   0x6   : > { %p111_p1 = scmp.eq.s32.totalorder %s110_s23, 0  ;;  %p124_p2 = scmp.eq.s32.totalorder %s4010_s19, 1 }
   0x7   : > { %p129_p3 = scmp.ne.s32.totalorder %s3951_s16, %s3947_s15  ;;  %p130_p4 = scmp.eq.s32.totalorder %s2682_s20, 1 }
   0x8   : > { %s4025_s24 = scalar_select %p111_p1, %s3955_s17, %s113_s22  }
   0x9   : > { %p4027_p5 = por %p124_p2, %p123_p0  ;;  %p4031_p6 = por %p130_p4, %p129_p3 }
   0xa   : > { %p2685_p7 = scmp.ge.s32.totalorder %s3959_s18, 1  ;;  %p166_p8 = scmp.lt.s32.totalorder %s3959_s18, 3 }
   0xc   : > { %p167_p9 = pnand %p2685_p7, %p166_p8 }
   0xd   : > { %v201_v0 = vld [vmem:[%s4586_s2] sm:$0xff] (!%p167_p9)  ;;  %v202_v1 = vld [vmem:[%s4586_s2 + $0x8] sm:$0xff] (!%p167_p9)  ;;  %v203_v2 = vld [vmem:[%s4586_s2 + $0x10] sm:$0xff] (!%p167_p9)  ;;  %s2687_s7 = sshll.u32 (!%p167_p9), %s4010_s19, 1  ;;  %vm911_vm0 = vcmask (!%p167_p9), 1043456   ;;  %vm904_vm1 = vcmask (!%p167_p9), 31744  }
   0xe   : > { %170 = sbr.rel (%p167_p9) target bundleno = 1377 (0x561), region = 36  ;;  %v219_v3 = vand.u32 (!%p167_p9), 4294901760, %v201_v0  ;;  %v222_v4 = vand.u32 (!%p167_p9), 4294901760, %v202_v1  ;;  %v204_v5 = vld [vmem:[%s4586_s2 + $0x18] sm:$0xff] (!%p167_p9)  ;;  %v225_v6 = vand.u32 (!%p167_p9), 4294901760, %v203_v2  ;;  %v205_v7 = vld [vmem:[%s4586_s2 + $0x20] sm:$0xff] (!%p167_p9) }
   0xf   : > { %v206_v8 = vld [vmem:[%s4586_s2 + $0x28] sm:$0xff] (!%p167_p9)  ;;  %v228_v9 = vand.u32 (!%p167_p9), 4294901760, %v204_v5  ;;  %v231_v11 = vand.u32 (!%p167_p9), 4294901760, %v205_v7  ;;  %v207_v14 = vld [vmem:[%s4586_s2 + $0x30] sm:$0xff] (!%p167_p9)  ;;  %v4066_v15 = vld [vmem:[%s4586_s2 + $0x38] sm:$0xff] (!%p167_p9)  ;;  %p193_p10 = scmp.lt.s32.totalorder (!%p167_p9), %s2687_s7, 3 }
  0x10   : > { %v4056_v10 = vpack.c.bf16 (!%p167_p9), %v222_v4, %v219_v3  ;;  %v234_v12 = vand.u32 (!%p167_p9), 4294901760, %v206_v8  ;;  %v237_v17 = vand.u32 (!%p167_p9), 4294901760, %v207_v14  ;;  %v240_v18 = vand.u32 (!%p167_p9), 4294901760, %v4066_v15  ;;  %v209_v19 = vld [vmem:[%s4586_s2 + $0x40] sm:$0xff] (!%p167_p9)  ;;  %v210_v20 = vld [vmem:[%s4586_s2 + $0x48] sm:$0xff] (!%p167_p9)  ;;  %v211_v22 = vld [vmem:[%s4586_s2 + $0x50] sm:$0xff] (!%p167_p9) }
  0x11   : > { %v4058_v13 = vpack.c.bf16 (!%p167_p9), %v228_v9, %v225_v6  ;;  %v243_v21 = vand.u32 (!%p167_p9), 4294901760, %v209_v19  ;;  %v246_v25 = vand.u32 (!%p167_p9), 4294901760, %v210_v20  ;;  %v212_v26 = vld [vmem:[%s4586_s2 + $0x58] sm:$0xff] (!%p167_p9)  ;;  %v4098_v28 = vsub.f32 (!%p167_p9), %v201_v0, %v219_v3  ;;  %v213_v31 = vld [vmem:[%s4586_s2 + $0x60] sm:$0xff] (!%p167_p9)  ;;  %v214_v32 = vld [vmem:[%s4586_s2 + $0x68] sm:$0xff] (!%p167_p9)  ;;  %s189_s6 = sand.u32 (!%p167_p9), 1, %s3951_s16  }
  0x12   : > { %3429 = vmatprep.subr.bf16.mxu0 (!%p167_p9), %v4056_v10  ;;  %v4071_v16 = vpack.c.bf16 (!%p167_p9), %v234_v12, %v231_v11  ;;  %v4090_v24 = vpack.c.bf16 (!%p167_p9), %v240_v18, %v237_v17  ;;  %v249_v30 = vand.u32 (!%p167_p9), 4294901760, %v211_v22  ;;  %v252_v34 = vand.u32 (!%p167_p9), 4294901760, %v212_v26  ;;  %v215_v35 = vld [vmem:[%s4586_s2 + $0x70] sm:$0xff] (!%p167_p9)  ;;  %v216_v36 = vld [vmem:[%s4586_s2 + $0x78] sm:$0xff] (!%p167_p9)  ;;  %s2686_s8 = sshll.u32 (!%p167_p9), %s189_s6, 4  ;;  %s3961_s23 = smov (!%p167_p9), [#allocation2]  }
  0x13   : > { %3431 = vmatpush3.bf16.msra.mxu0 (!%p167_p9), %v4056_v10  ;;  %v4119_v37 = vsub.f32 (!%p167_p9), %v202_v1, %v222_v4  ;;  %v4121_v38 = vsub.f32 (!%p167_p9), %v203_v2, %v225_v6  ;;  %v4123_v39 = vsub.f32 (!%p167_p9), %v204_v5, %v228_v9  ;;  %v4126_v40 = vpack.c.bf16 (!%p167_p9), %v246_v25, %v243_v21  ;;  %s191_s11 = scalar_lea.vmem (!%p167_p9), [#allocation2], %s2686_s8  ;;  %s3901_s27 = sshll.u32 (!%p167_p9), %s3961_s23, 4  ;;  %s3902_s27 = int_to_ptr.vmem [resolvable:$false] %s3901_s27 }
  0x14   : > { %3433 = vmatprep.subr.bf16.mxu0 (!%p167_p9), %v4058_v13  ;;  %v322_v43 = vand.u32 (!%p167_p9), 4294901760, %v4098_v28  ;;  %v255_v44 = vand.u32 (!%p167_p9), 4294901760, %v213_v31  ;;  %v258_v45 = vand.u32 (!%p167_p9), 4294901760, %v214_v32  ;;  %v261_v46 = vand.u32 (!%p167_p9), 4294901760, %v215_v35  ;;  %s2620_s12 = sshll.u32 (!%p167_p9), %s191_s11, 4  ;;  %s3903_s28 = scalar_lea.vmem (!%p167_p9), %s3902_s27, 512  ;;  %s4536_s12 = int_to_ptr.vmem [resolvable:$true] %s2620_s12 }
  0x15   : > { %s4596_s7 = smov (!%p193_p10, %s2687_s7), 3  ;;  %v264_v47 = vand.u32 4294901760, %v216_v36  ;;  %v4136_v49 = vsub.f32 %v205_v7, %v231_v11  ;;  %v329_v50 = vand.u32 4294901760, %v4119_v37  ;;  %v336_v51 = vand.u32 4294901760, %v4121_v38  ;;  %s3897_s22 = scalar_lea.vmem %s4536_s12, 256 }
  0x16   : > { %s2688_s5 = sshll.u32 %s4596_s7, 3  ;;  %v343_v52 = vand.u32 4294901760, %v4123_v39  ;;  %v4142_v53 = vsub.f32 %v206_v8, %v234_v12  ;;  %v4145_v54 = vpack.c.bf16 %v252_v34, %v249_v30  ;;  %v323_v56 = vsub.f32 %v4098_v28, %v322_v43  ;;  %s2695_s7 = sshll.u32 %s4010_s19, 8 }
  0x17   : > { %s196_s9 = scalar_lea.vmem %s4584_s0, %s2688_s5  ;;  %3435 = vmatpush3.bf16.msra.mxu0 %v4058_v13  ;;  %v4152_v58 = vpack.c.bf16 %v258_v45, %v255_v44  ;;  %v4154_v59 = vpack.c.bf16 %v264_v47, %v261_v46  ;;  %v350_v60 = vand.u32 4294901760, %v4136_v49  ;;  %v4157_v61 = vsub.f32 %v207_v14, %v237_v17  ;;  %s4541_s20 = scalar_lea.hbm %s4588_s4, %s2695_s7 }
  0x18   : > { %v4087_v23 = vld [vmem:[%s196_s9] sm:$0xff]  ;;  %3437 = vmatprep.subr.bf16.mxu0 %v4071_v16  ;;  %v4100_v29 = vld [vmem:[%s196_s9 + $0x8] sm:$0xff]  ;;  %v330_v62 = vsub.f32 %v4119_v37, %v329_v50  ;;  %v337_v63 = vsub.f32 %v4121_v38, %v336_v51  ;;  %v344_v0 = vsub.f32 %v4123_v39, %v343_v52  ;;  %v357_v1 = vand.u32 4294901760, %v4142_v53  ;;  %s4543_s19 = scalar_lea.sflag [#allocation3], %s189_s6  ;;  %p3898_p11 = scmp.ne.s32.totalorder %s4536_s12, %s3897_s22 }
  0x19   : > { %v4096_v27 = vand.u32 4294901760, %v4087_v23  ;;  %v4130_v42 = vand.u32 4294901760, %v4100_v29  ;;  %v324_v2 = vand.u32 4294901760, %v323_v56  ;;  %v4167_v4 = vsub.f32 %v4066_v15, %v240_v18  ;;  %p3904_p0 = scmp.lt.s32.totalorder %s4536_s12, %s3902_s27  ;;  %p3905_p1 = scmp.lt.s32.totalorder %s3903_s28, %s3897_s22 }
  0x1a   : > { %v4169_v5 = vsub.f32 %v209_v19, %v243_v21  ;;  %v4171_v6 = vsub.f32 %v210_v20, %v246_v25  ;;  %v4173_v7 = vsub.f32 %v211_v22, %v249_v30  ;;  %v4175_v8 = vsub.f32 %v212_v26, %v252_v34  ;;  %p3899_p12 = pnand %p3898_p11, %p4027_p5 }
  0x1b   : > { %v4110_v33 = vsub.f32 %v4087_v23, %v4096_v27  ;;  %3439 = vmatpush3.bf16.msra.mxu0 %v4071_v16  ;;  %v4150_v57 = vsub.f32 %v4100_v29, %v4130_v42  ;;  %v4177_v9 = vsub.f32 %v213_v31, %v255_v44  ;;  %v351_v11 = vsub.f32 %v4136_v49, %v350_v60  ;;  %p3906_p2 = por %p3905_p1, %p3904_p0 }
  0x1c   : > { %3441 = vmatprep.subr.bf16.mxu0 %v4090_v24  ;;  %v4180_v12 = vsub.f32 %v214_v32, %v258_v45  ;;  %v4182_v14 = vsub.f32 %v215_v35, %v261_v46  ;;  %v4184_v17 = vsub.f32 %v216_v36, %v264_v47  ;;  %v331_v15 = vand.u32 4294901760, %v330_v62  ;;  %p3900_p13 = pneg %p3899_p12 }
  0x1d   : > { %v301_v41 = vand.u32 4294901760, %v4110_v33  ;;  %v311_v3 = vand.u32 4294901760, %v4150_v57  ;;  %v338_v18 = vand.u32 4294901760, %v337_v63  ;;  %v345_v19 = vand.u32 4294901760, %v344_v0 }
  0x1e   : > { %v358_v20 = vsub.f32 %v4142_v53, %v357_v1  ;;  %v364_v22 = vand.u32 4294901760, %v4157_v61  ;;  %v371_v25 = vand.u32 4294901760, %v4167_v4  ;;  %v378_v26 = vand.u32 4294901760, %v4169_v5  ;;  %p3907_p3 = pnand %p3906_p2, %p3900_p13 }
  0x1f   : > { %v302_v48 = vsub.f32 %v4110_v33, %v301_v41  ;;  %3443 = vmatpush3.bf16.msra.mxu0 %v4090_v24  ;;  %v312_v21 = vsub.f32 %v4150_v57, %v311_v3  ;;  %v385_v30 = vand.u32 4294901760, %v4171_v6  ;;  %v392_v31 = vand.u32 4294901760, %v4173_v7 }
  0x20   : > { %3445 = vmatprep.subr.bf16.mxu0 %v4126_v40  ;;  %v399_v32 = vand.u32 4294901760, %v4175_v8  ;;  %v406_v34 = vand.u32 4294901760, %v4177_v9  ;;  %v413_v35 = vand.u32 4294901760, %v4180_v12  ;;  %v420_v36 = vand.u32 4294901760, %v4182_v14 }
  0x21   : > { %v303_v55 = vand.u32 4294901760, %v302_v48  ;;  %v427_v44 = vand.u32 4294901760, %v4184_v17  ;;  %v4202_v45 = vpack.c.bf16 %v329_v50, %v322_v43  ;;  %v4205_v46 = vpack.c.bf16 %v343_v52, %v336_v51 }
  0x22   : > { %v4207_v47 = vpack.c.bf16 %v357_v1, %v350_v60  ;;  %v4209_v48 = vpack.c.bf16 %v371_v25, %v364_v22  ;;  %v4214_v56 = vpack.c.bf16 %v331_v15, %v324_v2  ;;  %v4216_v62 = vpack.c.bf16 %v399_v32, %v392_v31 }
  0x23   : > { %2980 = vmatprep.mubr.f32.mxu0 %v303_v55  ;;  %3447 = vmatpush3.bf16.msra.mxu0 %v4126_v40  ;;  %v4211_v55 = vpack.c.bf16 %v385_v30, %v378_v26  ;;  %v4218_v63 = vpack.c.bf16 %v413_v35, %v406_v34  ;;  %v4220_v43 = vpack.c.bf16 %v427_v44, %v420_v36  ;;  %v313_v50 = vand.u32 4294901760, %v312_v21 }
  0x24   : > { %3449 = vmatprep.subr.bf16.mxu0 %v4145_v54  ;;  %v352_v51 = vand.u32 4294901760, %v351_v11  ;;  %v359_v52 = vand.u32 4294901760, %v358_v20  ;;  %v4224_v60 = vpack.c.bf16 %v345_v19, %v338_v18  ;;  %v365_v0 = vsub.f32 %v4157_v61, %v364_v22 }
  0x25   : > { %v372_v1 = vsub.f32 %v4167_v4, %v371_v25  ;;  %v379_v20 = vsub.f32 %v4169_v5, %v378_v26  ;;  %v386_v18 = vsub.f32 %v4171_v6, %v385_v30  ;;  %v393_v19 = vsub.f32 %v4173_v7, %v392_v31 }
  0x26   : > { %v4229_v2 = vpack.c.bf16 %v359_v52, %v352_v51  ;;  %v366_v15 = vand.u32 4294901760, %v365_v0  ;;  %v407_v52 = vsub.f32 %v4177_v9, %v406_v34  ;;  %v414_v31 = vsub.f32 %v4180_v12, %v413_v35 }
  0x27   : > { %3451 = vmatpush3.bf16.msra.mxu0 %v4145_v54  ;;  %v373_v11 = vand.u32 4294901760, %v372_v1  ;;  %v380_v22 = vand.u32 4294901760, %v379_v20  ;;  %v387_v25 = vand.u32 4294901760, %v386_v18  ;;  %v394_v51 = vand.u32 4294901760, %v393_v19 }
  0x28   : > { %3453 = vmatprep.subr.bf16.mxu0 %v4152_v58  ;;  %v421_v0 = vsub.f32 %v4182_v14, %v420_v36  ;;  %v4271_v18 = vpack.c.bf16 %v4123_v39, %v4121_v38  ;;  %v4291_v38 = vpack.c.bf16 %v4171_v6, %v4169_v5  ;;  %v4297_v39 = vpack.c.bf16 %v4175_v8, %v4173_v7 }
  0x29   : > { %v4238_v21 = vpack.c.bf16 %v373_v11, %v366_v15  ;;  %v4243_v26 = vpack.c.bf16 %v387_v25, %v380_v22  ;;  %v415_v15 = vand.u32 4294901760, %v414_v31  ;;  %v428_v11 = vsub.f32 %v4184_v17, %v427_v44 }
  0x2a   : > { %v422_v34 = vand.u32 4294901760, %v421_v0  ;;  %v4265_v44 = vpack.c.bf16 %v4119_v37, %v4098_v28  ;;  %v4279_v28 = vpack.c.bf16 %v4142_v53, %v4136_v49  ;;  %v4285_v37 = vpack.c.bf16 %v4167_v4, %v4157_v61 }
  0x2b   : > { %3455 = vmatpush3.bf16.msra.mxu0 %v4152_v58  ;;  %v429_v35 = vand.u32 4294901760, %v428_v11  ;;  %v4303_v49 = vpack.c.bf16 %v4180_v12, %v4177_v9  ;;  %v4309_v53 = vpack.c.bf16 %v4184_v17, %v4182_v14 }
  0x2c   : > { %3457 = vmatprep.subr.bf16.mxu0 %v4154_v59 }
  0x2d   : > { %v4259_v36 = vpack.c.bf16 %v429_v35, %v422_v34 }
  0x2f   : > { %3459 = vmatpush3.bf16.msra.mxu0 %v4154_v59 }
  0x30   : > { %3461 = vmatprep.subr.bf16.mxu0 %v4214_v56 }
  0x32   : > { %2981 = vmatmul.mubr.f32.vlgmr.msra.gmra.mrb[0].mxu0 %v313_v50  ;;  %v400_v50 = vsub.f32 %v4175_v8, %v399_v32  ;;  %v408_v32 = vand.u32 4294901760, %v407_v52 }
  0x33   : > { %3463 = vmatpush3.bf16.msra.mxu0 %v4214_v56  ;;  %3015 = vmatprep.mubr.f32.mxu0 %v4096_v27 }
  0x34   : > { %3465 = vmatprep.subr.bf16.mxu0 %v4224_v60  ;;  %v401_v30 = vand.u32 4294901760, %v400_v50  ;;  %v4255_v20 = vpack.c.bf16 %v415_v15, %v408_v32 }
  0x36   : > { %v4250_v1 = vpack.c.bf16 %v401_v30, %v394_v51 }
  0x37   : > { %3467 = vmatpush3.bf16.msra.mxu0 %v4224_v60 }
  0x38   : > { %3469 = vmatprep.subr.bf16.mxu0 %v4229_v2 }
  0x3b   : > { %3471 = vmatpush3.bf16.msra.mxu0 %v4229_v2 }
  0x3c   : > { %3473 = vmatprep.subr.bf16.mxu0 %v4238_v21 }
  0x3f   : > { %3475 = vmatpush3.bf16.msra.mxu0 %v4238_v21 }
  0x40   : > { %3477 = vmatprep.subr.bf16.mxu0 %v4243_v26 }
  0x43   : > { %3479 = vmatpush3.bf16.msra.mxu0 %v4243_v26 }
  0x44   : > { %3481 = vmatprep.subr.bf16.mxu0 %v4250_v1 }
  0x47   : > { %3483 = vmatpush3.bf16.msra.mxu0 %v4250_v1 }
  0x48   : > { %3485 = vmatprep.subr.bf16.mxu0 %v4255_v20 }
  0x4b   : > { %3487 = vmatpush3.bf16.msra.mxu0 %v4255_v20 }
  0x4c   : > { %3489 = vmatprep.subr.bf16.mxu0 %v4259_v36 }
  0x4f   : > { %3491 = vmatpush3.bf16.msra.mxu0 %v4259_v36 }
  0x50   : > { %3493 = vmatprep.subr.bf16.mxu0 %v4265_v44 }
  0x52   : > { %3016 = vmatmul.mubr.f32.vlgmr.msra.gmra.mrb[0].mxu0 %v4130_v42 }
  0x53   : > { %3495 = vmatpush3.bf16.msra.mxu0 %v4265_v44  ;;  %3050 = vmatprep.mubr.f32.mxu0 %v4110_v33 }
  0x54   : > { %3497 = vmatprep.subr.bf16.mxu0 %v4271_v18 }
  0x57   : > { %3499 = vmatpush3.bf16.msra.mxu0 %v4271_v18 }
  0x58   : > { %3501 = vmatprep.subr.bf16.mxu0 %v4279_v28 }
  0x5b   : > { %3503 = vmatpush3.bf16.msra.mxu0 %v4279_v28 }
  0x5c   : > { %3505 = vmatprep.subr.bf16.mxu0 %v4285_v37 }
  0x5f   : > { %3507 = vmatpush3.bf16.msra.mxu0 %v4285_v37 }
  0x60   : > { %3509 = vmatprep.subr.bf16.mxu0 %v4291_v38 }
  0x63   : > { %3511 = vmatpush3.bf16.msra.mxu0 %v4291_v38 }
  0x64   : > { %3513 = vmatprep.subr.bf16.mxu0 %v4297_v39 }
  0x67   : > { %3515 = vmatpush3.bf16.msra.mxu0 %v4297_v39 }
  0x68   : > { %3517 = vmatprep.subr.bf16.mxu0 %v4303_v49 }
  0x6b   : > { %3519 = vmatpush3.bf16.msra.mxu0 %v4303_v49 }
  0x6c   : > { %3521 = vmatprep.subr.bf16.mxu0 %v4309_v53 }
  0x6f   : > { %3523 = vmatpush3.bf16.msra.mxu0 %v4309_v53 }
  0x70   : > { %3525 = vmatprep.subr.bf16.mxu0 %v4056_v10 }
  0x72   : > { %3051 = vmatmul.mubr.f32.vlgmr.msra.gmra.mrb[0].mxu0 %v4150_v57 }
  0x73   : > { %3527 = vmatpush3.bf16.msra.mxu0 %v4056_v10  ;;  %3085 = vmatprep.mubr.f32.mxu0 %v301_v41 }
  0x74   : > { %3529 = vmatprep.subr.bf16.mxu0 %v4058_v13 }
  0x77   : > { %3531 = vmatpush3.bf16.msra.mxu0 %v4058_v13 }
  0x78   : > { %3533 = vmatprep.subr.bf16.mxu0 %v4071_v16 }
  0x7b   : > { %3535 = vmatpush3.bf16.msra.mxu0 %v4071_v16 }
  0x7c   : > { %3537 = vmatprep.subr.bf16.mxu0 %v4090_v24 }
  0x7f   : > { %3539 = vmatpush3.bf16.msra.mxu0 %v4090_v24 }
  0x80   : > { %3541 = vmatprep.subr.bf16.mxu0 %v4126_v40 }
  0x83   : > { %3543 = vmatpush3.bf16.msra.mxu0 %v4126_v40 }
  0x84   : > { %3545 = vmatprep.subr.bf16.mxu0 %v4145_v54 }
  0x87   : > { %3547 = vmatpush3.bf16.msra.mxu0 %v4145_v54 }
  0x88   : > { %3549 = vmatprep.subr.bf16.mxu0 %v4152_v58 }
  0x8b   : > { %3551 = vmatpush3.bf16.msra.mxu0 %v4152_v58 }
  0x8c   : > { %3553 = vmatprep.subr.bf16.mxu0 %v4154_v59 }
  0x8f   : > { %3555 = vmatpush3.bf16.msra.mxu0 %v4154_v59 }
  0x90   : > { %3557 = vmatprep.subr.bf16.mxu0 %v4202_v45 }
  0x92   : > { %3086 = vmatmul.mubr.f32.vlgmr.msra.gmra.mrb[0].mxu0 %v311_v3 }
  0x93   : > { %3559 = vmatpush3.bf16.msra.mxu0 %v4202_v45  ;;  %3120 = vmatprep.mubr.f32.mxu0 %v4096_v27 }
  0x94   : > { %3561 = vmatprep.subr.bf16.mxu0 %v4205_v46 }
  0x97   : > { %3563 = vmatpush3.bf16.msra.mxu0 %v4205_v46 }
  0x98   : > { %3565 = vmatprep.subr.bf16.mxu0 %v4207_v47 }
  0x9b   : > { %3567 = vmatpush3.bf16.msra.mxu0 %v4207_v47 }
  0x9c   : > { %3569 = vmatprep.subr.bf16.mxu0 %v4209_v48 }
  0x9f   : > { %3571 = vmatpush3.bf16.msra.mxu0 %v4209_v48 }
  0xa0   : > { %3573 = vmatprep.subr.bf16.mxu0 %v4211_v55 }
  0xa3   : > { %3575 = vmatpush3.bf16.msra.mxu0 %v4211_v55 }
  0xa4   : > { %3577 = vmatprep.subr.bf16.mxu0 %v4216_v62 }
  0xa7   : > { %3579 = vmatpush3.bf16.msra.mxu0 %v4216_v62 }
  0xa8   : > { %3581 = vmatprep.subr.bf16.mxu0 %v4218_v63 }
  0xab   : > { %3583 = vmatpush3.bf16.msra.mxu0 %v4218_v63 }
  0xac   : > { %3585 = vmatprep.subr.bf16.mxu0 %v4220_v43 }
  0xaf   : > { %3587 = vmatpush3.bf16.msra.mxu0 %v4220_v43 }
  0xb0   : > { %3589 = vmatprep.subr.bf16.mxu0 %v4056_v10 }
  0xb2   : > { %3121 = vmatmul.mubr.f32.vlgmr.msra.gmra.mrb[0].mxu0 %v4130_v42 }
  0xb3   : > { %3591 = vmatpush3.bf16.msra.mxu0 %v4056_v10  ;;  %3155 = vmatprep.mubr.f32.mxu0 %v4096_v27  ;;  %v217_v27 = vld [vmem:[%s4587_s3] sm:$0xf] }
  0xb4   : > { %3593 = vmatprep.subr.bf16.mxu0 %v4058_v13  ;;  %v913_v33 = vsel %vm911_vm0, %v217_v27, 0 }
  0xb5   : > { %v4374_v41 = vand.u32 4294901760, %v913_v33 }
  0xb7   : > { %3595 = vmatpush3.bf16.msra.mxu0 %v4058_v13  ;;  %3158 = vmatprep.subr.mxu1 %v4374_v41  ;;  %v4381_v57 = vsub.f32 %v913_v33, %v4374_v41 }
  0xb8   : > { %3597 = vmatprep.subr.bf16.mxu0 %v4071_v16  ;;  %3159 = vmatpush3.msra.mxu1 %v4374_v41 }
  0xbb   : > { %3599 = vmatpush3.bf16.msra.mxu0 %v4071_v16 }
  0xbc   : > { %3601 = vmatprep.subr.bf16.mxu0 %v4090_v24 }
  0xbf   : > { %3603 = vmatpush3.bf16.msra.mxu0 %v4090_v24 }
  0xc0   : > { %3605 = vmatprep.subr.bf16.mxu0 %v4126_v40 }
  0xc3   : > { %3607 = vmatpush3.bf16.msra.mxu0 %v4126_v40 }
  0xc4   : > { %3609 = vmatprep.subr.bf16.mxu0 %v4145_v54 }
  0xc7   : > { %3611 = vmatpush3.bf16.msra.mxu0 %v4145_v54 }
  0xc8   : > { %3613 = vmatprep.subr.bf16.mxu0 %v4152_v58 }
  0xcb   : > { %3615 = vmatpush3.bf16.msra.mxu0 %v4152_v58 }
  0xcc   : > { %3617 = vmatprep.subr.bf16.mxu0 %v4154_v59 }
  0xcf   : > { %3619 = vmatpush3.bf16.msra.mxu0 %v4154_v59 }
  0xd0   : > { %3398 = vmatprep.subr.mxu0 %v4374_v41 }
  0xd2   : > { %3156 = vmatmul.mubr.f32.vlgmr.msra.gmra.mrb[0].mxu0 %v4130_v42  ;;  %v4384_v42 = vand.u32 4294901760, %v4381_v57 }
  0xd3   : > { %3399 = vmatpush3.msra.mxu0 %v4374_v41 }
  0xd4   : > { %v1005_v61 = vsub.f32 %v4381_v57, %v4384_v42 }
  0xd6   : > { %v4388_v3 = vand.u32 4294901760, %v1005_v61 }
  0xd8   : > { %3163 = vmatprep.subr.mxu1 %v4388_v3  ;;  %3403 = vmatprep.subr.mxu0 %v4388_v3 }
 0x1a5   : > { %v3157_v4 = vpop.f32.mrb[0].mxu0 }
 0x1a6   : > { %v903_v5 = vmul.f32 0.03125, %v3157_v4  ;;  %v892_v6 = vpop.f32.mrb[1].mxu0 }
 0x1a7   : > { %v902_v7 = vmul.f32 0.03125, %v892_v6 }
 0x1a8   : > { %v909_v8 = vsel %vm904_vm1, %v903_v5, 0 }
 0x1a9   : > { %v991_v9 = vand.u32 4294901760, %v909_v8  ;;  %v906_v12 = vsel %vm904_vm1, %v902_v7, 0 }
 0x1aa   : > { %v981_v14 = vand.u32 4294901760, %v906_v12 }
 0x1ab   : > { %v992_v17 = vsub.f32 %v909_v8, %v991_v9 }
 0x1ac   : > { %v982_v19 = vsub.f32 %v906_v12, %v981_v14 }
 0x1ad   : > { %v993_v22 = vand.u32 4294901760, %v992_v17 }
 0x1ae   : > { %v983_v25 = vand.u32 4294901760, %v982_v19 }
 0x1af   : > { %v994_v50 = vsub.f32 %v992_v17, %v993_v22 }
 0x1b0   : > { %v984_v51 = vsub.f32 %v982_v19, %v983_v25 }
 0x1b1   : > { %v995_v52 = vand.u32 4294901760, %v994_v50 }
 0x1b2   : > { %v985_v30 = vand.u32 4294901760, %v984_v51 }
 0x1b4   : > { %3160 = vmatprep.mubr.f32.mxu1 %v985_v30 }
 0x1b5   : > { %3161 = vmatmul.mubr.f32.vlgmr.msra.gmra.mrb[0].mxu1 %v995_v52 }
 0x1b6   : > { %3164 = vmatpush3.msra.mxu1 %v4388_v3  ;;  %3165 = vmatprep.mubr.f32.mxu1 %v981_v14 }
 0x1b7   : > { %3168 = vmatprep.subr.mxu1 %v4381_v57 }
 0x1bd   : > { %3166 = vmatmul.mubr.f32.vlgmr.msra.gmra.mrb[0].mxu1 %v991_v9 }
 0x1be   : > { %3169 = vmatpush3.msra.mxu1 %v4381_v57  ;;  %3170 = vmatprep.mubr.f32.mxu1 %v982_v19 }
 0x1bf   : > { %3173 = vmatprep.subr.mxu1 %v4374_v41 }
 0x1c5   : > { %3171 = vmatmul.mubr.f32.vlgmr.msra.gmra.mrb[0].mxu1 %v992_v17 }
 0x1c6   : > { %3174 = vmatpush3.msra.mxu1 %v4374_v41  ;;  %3175 = vmatprep.mubr.f32.mxu1 %v983_v25 }
 0x1c7   : > { %3178 = vmatprep.subr.mxu1 %v4384_v42 }
 0x1cd   : > { %3176 = vmatmul.mubr.f32.vlgmr.msra.gmra.mrb[0].mxu1 %v993_v22 }
 0x1ce   : > { %3179 = vmatpush3.msra.mxu1 %v4384_v42  ;;  %3180 = vmatprep.mubr.f32.mxu1 %v981_v14 }
 0x1cf   : > { %3183 = vmatprep.subr.mxu1 %v4374_v41 }
 0x1d5   : > { %3181 = vmatmul.mubr.f32.vlgmr.msra.gmra.mrb[0].mxu1 %v991_v9 }
 0x1d6   : > { %3184 = vmatpush3.msra.mxu1 %v4374_v41  ;;  %3185 = vmatprep.mubr.f32.mxu1 %v981_v14 }
 0x1d7   : > { %3621 = vmatprep.subr.bf16.mxu1 %v4056_v10 }
 0x1dd   : > { %3186 = vmatmul.mubr.f32.vlgmr.msra.gmra.mrb[0].mxu1 %v991_v9 }
 0x1de   : > { %3623 = vmatpush3.bf16.msra.mxu1 %v4056_v10 }
 0x1df   : > { %3625 = vmatprep.subr.bf16.mxu1 %v4058_v13 }
 0x1e2   : > { %3627 = vmatpush3.bf16.msra.mxu1 %v4058_v13 }
 0x1e3   : > { %3629 = vmatprep.subr.bf16.mxu1 %v4071_v16 }
 0x1e6   : > { %3631 = vmatpush3.bf16.msra.mxu1 %v4071_v16 }
 0x1e7   : > { %3633 = vmatprep.subr.bf16.mxu1 %v4090_v24 }
 0x1ea   : > { %3635 = vmatpush3.bf16.msra.mxu1 %v4090_v24 }
 0x1eb   : > { %3637 = vmatprep.subr.bf16.mxu1 %v4126_v40 }
 0x1ee   : > { %3639 = vmatpush3.bf16.msra.mxu1 %v4126_v40 }
 0x1ef   : > { %3641 = vmatprep.subr.bf16.mxu1 %v4145_v54 }
 0x1f2   : > { %3643 = vmatpush3.bf16.msra.mxu1 %v4145_v54 }
 0x1f3   : > { %3645 = vmatprep.subr.bf16.mxu1 %v4152_v58 }
 0x1f6   : > { %3647 = vmatpush3.bf16.msra.mxu1 %v4152_v58 }
 0x1f7   : > { %3649 = vmatprep.subr.bf16.mxu1 %v4154_v59 }
 0x1fa   : > { %3651 = vmatpush3.bf16.msra.mxu1 %v4154_v59 }
 0x1fb   : > { %3653 = vmatprep.subr.bf16.mxu1 %v4214_v56 }
 0x2b0   : > { %v3187_v31 = vpop.f32.mrb[0].mxu1 }
 0x2b1   : > { %v1405_v0 = vsub.f32 %v4100_v29, %v3187_v31  ;;  %v1394_v32 = vpop.f32.mrb[1].mxu1 }
 0x2b2   : > { %v1404_v15 = vsub.f32 %v4087_v23, %v1394_v32 }
 0x2b3   : > { %v1407_v11 = vmul.f32 %v1405_v0, %v1405_v0 }
 0x2b4   : > { %v1406_v34 = vmul.f32 %v1404_v15, %v1404_v15 }
 0x2b5   : > { %v4422_v35 = vand.u32 4294901760, %v1407_v11 }
 0x2b6   : > { %v4424_v27 = vand.u32 4294901760, %v1406_v34 }
 0x2b7   : > { %v4427_v33 = vsub.f32 %v1407_v11, %v4422_v35 }
 0x2b8   : > { %v1490_v61 = vsub.f32 %v1406_v34, %v4424_v27 }
 0x2b9   : > { %v1501_v4 = vand.u32 4294901760, %v4427_v33 }
 0x2ba   : > { %v1491_v5 = vand.u32 4294901760, %v1490_v61 }
 0x2bb   : > { %v1502_v6 = vsub.f32 %v4427_v33, %v1501_v4 }
 0x2bc   : > { %v1492_v7 = vsub.f32 %v1490_v61, %v1491_v5 }
 0x2bd   : > { %v1503_v9 = vand.u32 4294901760, %v1502_v6 }
 0x2be   : > { %v1493_v8 = vand.u32 4294901760, %v1492_v7 }
 0x2c0   : > { %3220 = vmatprep.mubr.f32.mxu1 %v1493_v8 }
 0x2c1   : > { %3221 = vmatmul.mubr.f32.vlgmr.msra.gmra.mrb[2].mxu1 %v1503_v9 }
 0x2c2   : > { %3655 = vmatpush3.bf16.msra.mxu1 %v4214_v56  ;;  %3255 = vmatprep.mubr.f32.mxu1 %v4424_v27 }
 0x2c3   : > { %3657 = vmatprep.subr.bf16.mxu1 %v4224_v60 }
 0x2c6   : > { %3659 = vmatpush3.bf16.msra.mxu1 %v4224_v60 }
 0x2c7   : > { %3661 = vmatprep.subr.bf16.mxu1 %v4229_v2 }
 0x2ca   : > { %3663 = vmatpush3.bf16.msra.mxu1 %v4229_v2 }
 0x2cb   : > { %3665 = vmatprep.subr.bf16.mxu1 %v4238_v21 }
 0x2ce   : > { %3667 = vmatpush3.bf16.msra.mxu1 %v4238_v21 }
 0x2cf   : > { %3669 = vmatprep.subr.bf16.mxu1 %v4243_v26 }
 0x2d2   : > { %3671 = vmatpush3.bf16.msra.mxu1 %v4243_v26 }
 0x2d3   : > { %3673 = vmatprep.subr.bf16.mxu1 %v4250_v1 }
 0x2d6   : > { %3675 = vmatpush3.bf16.msra.mxu1 %v4250_v1  ;;  %v2689_v1 = vld [vmem:[%s4585_s1] ss:$0 sm:$0xff] }
 0x2d7   : > { %3677 = vmatprep.subr.bf16.mxu1 %v4255_v20 }
 0x2da   : > { %3679 = vmatpush3.bf16.msra.mxu1 %v4255_v20 }
 0x2db   : > { %3681 = vmatprep.subr.bf16.mxu1 %v4259_v36 }
 0x2de   : > { %3683 = vmatpush3.bf16.msra.mxu1 %v4259_v36 }
 0x2df   : > { %3685 = vmatprep.subr.bf16.mxu1 %v4265_v44 }
 0x2e1   : > { %3256 = vmatmul.mubr.f32.vlgmr.msra.gmra.mrb[2].mxu1 %v4422_v35 }
 0x2e2   : > { %3687 = vmatpush3.bf16.msra.mxu1 %v4265_v44  ;;  %3290 = vmatprep.mubr.f32.mxu1 %v1490_v61 }
 0x2e3   : > { %3689 = vmatprep.subr.bf16.mxu1 %v4271_v18 }
 0x2e6   : > { %3691 = vmatpush3.bf16.msra.mxu1 %v4271_v18 }
 0x2e7   : > { %3693 = vmatprep.subr.bf16.mxu1 %v4279_v28 }
 0x2ea   : > { %3695 = vmatpush3.bf16.msra.mxu1 %v4279_v28 }
 0x2eb   : > { %3697 = vmatprep.subr.bf16.mxu1 %v4285_v37 }
 0x2ee   : > { %3699 = vmatpush3.bf16.msra.mxu1 %v4285_v37 }
 0x2ef   : > { %3701 = vmatprep.subr.bf16.mxu1 %v4291_v38 }
 0x2f2   : > { %3703 = vmatpush3.bf16.msra.mxu1 %v4291_v38 }
 0x2f3   : > { %3705 = vmatprep.subr.bf16.mxu1 %v4297_v39 }
 0x2f6   : > { %3707 = vmatpush3.bf16.msra.mxu1 %v4297_v39 }
 0x2f7   : > { %3709 = vmatprep.subr.bf16.mxu1 %v4303_v49 }
 0x2fa   : > { %3711 = vmatpush3.bf16.msra.mxu1 %v4303_v49 }
 0x2fb   : > { %3713 = vmatprep.subr.bf16.mxu1 %v4309_v53 }
 0x2fe   : > { %3715 = vmatpush3.bf16.msra.mxu1 %v4309_v53 }
 0x2ff   : > { %3717 = vmatprep.subr.bf16.mxu1 %v4056_v10 }
 0x301   : > { %3291 = vmatmul.mubr.f32.vlgmr.msra.gmra.mrb[2].mxu1 %v4427_v33 }
 0x302   : > { %3719 = vmatpush3.bf16.msra.mxu1 %v4056_v10  ;;  %3325 = vmatprep.mubr.f32.mxu1 %v1491_v5 }
 0x303   : > { %3721 = vmatprep.subr.bf16.mxu1 %v4058_v13 }
 0x306   : > { %3723 = vmatpush3.bf16.msra.mxu1 %v4058_v13 }
 0x307   : > { %3725 = vmatprep.subr.bf16.mxu1 %v4071_v16 }
 0x30a   : > { %3727 = vmatpush3.bf16.msra.mxu1 %v4071_v16 }
 0x30b   : > { %3729 = vmatprep.subr.bf16.mxu1 %v4090_v24 }
 0x30e   : > { %3731 = vmatpush3.bf16.msra.mxu1 %v4090_v24 }
 0x30f   : > { %3733 = vmatprep.subr.bf16.mxu1 %v4126_v40 }
 0x312   : > { %3735 = vmatpush3.bf16.msra.mxu1 %v4126_v40 }
 0x313   : > { %3737 = vmatprep.subr.bf16.mxu1 %v4145_v54 }
 0x316   : > { %3739 = vmatpush3.bf16.msra.mxu1 %v4145_v54 }
 0x317   : > { %3741 = vmatprep.subr.bf16.mxu1 %v4152_v58 }
 0x31a   : > { %3743 = vmatpush3.bf16.msra.mxu1 %v4152_v58 }
 0x31b   : > { %3745 = vmatprep.subr.bf16.mxu1 %v4154_v59 }
 0x31e   : > { %3747 = vmatpush3.bf16.msra.mxu1 %v4154_v59 }
 0x31f   : > { %3749 = vmatprep.subr.bf16.mxu1 %v4202_v45 }
 0x321   : > { %3326 = vmatmul.mubr.f32.vlgmr.msra.gmra.mrb[2].mxu1 %v1501_v4 }
 0x322   : > { %3751 = vmatpush3.bf16.msra.mxu1 %v4202_v45  ;;  %3360 = vmatprep.mubr.f32.mxu1 %v4424_v27 }
 0x323   : > { %3753 = vmatprep.subr.bf16.mxu1 %v4205_v46 }
 0x326   : > { %3755 = vmatpush3.bf16.msra.mxu1 %v4205_v46 }
 0x327   : > { %3757 = vmatprep.subr.bf16.mxu1 %v4207_v47 }
 0x32a   : > { %3759 = vmatpush3.bf16.msra.mxu1 %v4207_v47 }
 0x32b   : > { %3761 = vmatprep.subr.bf16.mxu1 %v4209_v48 }
 0x32e   : > { %3763 = vmatpush3.bf16.msra.mxu1 %v4209_v48 }
 0x32f   : > { %3765 = vmatprep.subr.bf16.mxu1 %v4211_v55 }
 0x332   : > { %3767 = vmatpush3.bf16.msra.mxu1 %v4211_v55 }
 0x333   : > { %3769 = vmatprep.subr.bf16.mxu1 %v4216_v62 }
 0x336   : > { %3771 = vmatpush3.bf16.msra.mxu1 %v4216_v62 }
 0x337   : > { %3773 = vmatprep.subr.bf16.mxu1 %v4218_v63 }
 0x33a   : > { %3775 = vmatpush3.bf16.msra.mxu1 %v4218_v63 }
 0x33b   : > { %3777 = vmatprep.subr.bf16.mxu1 %v4220_v43 }
 0x33e   : > { %3779 = vmatpush3.bf16.msra.mxu1 %v4220_v43 }
 0x33f   : > { %3781 = vmatprep.subr.bf16.mxu1 %v4056_v10 }
 0x341   : > { %3361 = vmatmul.mubr.f32.vlgmr.msra.gmra.mrb[2].mxu1 %v4422_v35 }
 0x342   : > { %3783 = vmatpush3.bf16.msra.mxu1 %v4056_v10  ;;  %3395 = vmatprep.mubr.f32.mxu1 %v4424_v27 }
 0x343   : > { %3785 = vmatprep.subr.bf16.mxu1 %v4058_v13 }
 0x346   : > { %3787 = vmatpush3.bf16.msra.mxu1 %v4058_v13 }
 0x347   : > { %3789 = vmatprep.subr.bf16.mxu1 %v4071_v16 }
 0x34a   : > { %3791 = vmatpush3.bf16.msra.mxu1 %v4071_v16 }
 0x34b   : > { %3793 = vmatprep.subr.bf16.mxu1 %v4090_v24 }
 0x34e   : > { %3795 = vmatpush3.bf16.msra.mxu1 %v4090_v24 }
 0x34f   : > { %3797 = vmatprep.subr.bf16.mxu1 %v4126_v40 }
 0x352   : > { %3799 = vmatpush3.bf16.msra.mxu1 %v4126_v40 }
 0x353   : > { %3801 = vmatprep.subr.bf16.mxu1 %v4145_v54 }
 0x356   : > { %3803 = vmatpush3.bf16.msra.mxu1 %v4145_v54 }
 0x357   : > { %3805 = vmatprep.subr.bf16.mxu1 %v4152_v58 }
 0x35a   : > { %3807 = vmatpush3.bf16.msra.mxu1 %v4152_v58 }
 0x35b   : > { %3809 = vmatprep.subr.bf16.mxu1 %v4154_v59 }
 0x35e   : > { %3811 = vmatpush3.bf16.msra.mxu1 %v4154_v59 }
 0x361   : > { %3396 = vmatmul.mubr.f32.vlgmr.msra.gmra.mrb[2].mxu1 %v4422_v35 }
 0x434   : > { %v3397_v10 = vpop.f32.mrb[2].mxu1 }
 0x435   : > { %v2093_v13 = vmul.f32 0.03125, %v3397_v10  ;;  %v2082_v16 = vpop.f32.mrb[3].mxu1 }
 0x436   : > { %v2092_v24 = vmul.f32 0.03125, %v2082_v16 }
 0x437   : > { %v2095_v45 = vadd.f32 1e-05, %v2093_v13 }
 0x438   : > { %v2094_v40 = vadd.f32 1e-05, %v2092_v24 }
 0x439   : > { %3893 = vrsqrt.f32 %v2095_v45 }
 0x43a   : > { %3895 = vrsqrt.f32 %v2094_v40 }
 0x443   : > { %v3894_v46 = vpop.eup %3893 }
 0x444   : > { %v3896_v54 = vpop.eup %3895  ;;  %v2102_v47 = vsel %vm904_vm1, %v3894_v46, 0 }
 0x445   : > { %v2180_v48 = vand.u32 4294901760, %v2102_v47  ;;  %v2099_v58 = vsel %vm904_vm1, %v3896_v54, 0 }
 0x446   : > { %v2170_v55 = vand.u32 4294901760, %v2099_v58 }
 0x447   : > { %v2181_v56 = vsub.f32 %v2102_v47, %v2180_v48 }
 0x448   : > { %v2171_v59 = vsub.f32 %v2099_v58, %v2170_v55 }
 0x449   : > { %v2182_v62 = vand.u32 4294901760, %v2181_v56 }
 0x44a   : > { %v2172_v63 = vand.u32 4294901760, %v2171_v59 }
 0x44b   : > { %v2183_v43 = vsub.f32 %v2181_v56, %v2182_v62 }
 0x44c   : > { %v2173_v60 = vsub.f32 %v2171_v59, %v2172_v63 }
 0x44d   : > { %v2184_v21 = vand.u32 4294901760, %v2183_v43 }
 0x44e   : > { %v2174_v2 = vand.u32 4294901760, %v2173_v60 }
 0x450   : > { %3400 = vmatprep.mubr.f32.mxu0 %v2174_v2 }
 0x451   : > { %3401 = vmatmul.mubr.f32.vlgmr.msra.gmra.mrb[2].mxu0 %v2184_v21 }
 0x452   : > { %3404 = vmatpush3.msra.mxu0 %v4388_v3  ;;  %3405 = vmatprep.mubr.f32.mxu0 %v2170_v55 }
 0x453   : > { %3408 = vmatprep.subr.mxu0 %v4381_v57 }
 0x459   : > { %3406 = vmatmul.mubr.f32.vlgmr.msra.gmra.mrb[2].mxu0 %v2180_v48 }
 0x45a   : > { %3409 = vmatpush3.msra.mxu0 %v4381_v57  ;;  %3410 = vmatprep.mubr.f32.mxu0 %v2171_v59 }
 0x45b   : > { %3413 = vmatprep.subr.mxu0 %v4374_v41 }
 0x461   : > { %3411 = vmatmul.mubr.f32.vlgmr.msra.gmra.mrb[2].mxu0 %v2181_v56 }
 0x462   : > { %3414 = vmatpush3.msra.mxu0 %v4374_v41  ;;  %3415 = vmatprep.mubr.f32.mxu0 %v2172_v63 }
 0x463   : > { %3418 = vmatprep.subr.mxu0 %v4384_v42 }
 0x469   : > { %3416 = vmatmul.mubr.f32.vlgmr.msra.gmra.mrb[2].mxu0 %v2182_v62 }
 0x46a   : > { %3419 = vmatpush3.msra.mxu0 %v4384_v42  ;;  %3420 = vmatprep.mubr.f32.mxu0 %v2170_v55 }
 0x46b   : > { %3423 = vmatprep.subr.mxu0 %v4374_v41 }
 0x471   : > { %3421 = vmatmul.mubr.f32.vlgmr.msra.gmra.mrb[2].mxu0 %v2180_v48 }
 0x472   : > { %3424 = vmatpush3.msra.mxu0 %v4374_v41  ;;  %3425 = vmatprep.mubr.f32.mxu0 %v2170_v55 }
 0x479   : > { %3426 = vmatmul.mubr.f32.vlgmr.msra.gmra.mrb[2].mxu0 %v2180_v48 }
 0x54c   : > { %v3427_v26 = vpop.f32.mrb[2].mxu0 }
 0x54d   : > { %v2594_v20 = vmul.f32 %v3427_v26, %v4100_v29  ;;  %v2583_v36 = vpop.f32.mrb[3].mxu0 }
 0x54e   : > { %v2593_v44 = vmul.f32 %v2583_v36, %v4087_v23 }
 0x54f   : > { %v2603_v18 = vmul.f32 %v2689_v1, %v2594_v20 }
 0x550   : > { %v2602_v28 = vmul.f32 %v2689_v1, %v2593_v44 }
 0x551   : > { %2605 = vst [vmem:[%s191_s11 + $0x8] sm:$0xff] %v2603_v18 }
 0x552   : > { %2604 = vst [vmem:[%s191_s11] sm:$0xff] %v2602_v28 }
 0x553   : > { %3910 = shalt.err (!%p3907_p3)
}
 0x554   : > { %s3911_s29 = scalar_lea.hbm %s4541_s20, 256  ;;  %s3915_s6 = scalar_lea.hbm %s4588_s4, 512 }
 0x555   : > { %p3912_p4 = scmp.ne.s32.totalorder %s4541_s20, %s3911_s29  ;;  %p3916_p9 = scmp.lt.u32.totalorder %s4541_s20, %s4588_s4 }
 0x556   : > { %p3917_p10 = scmp.lt.u32.totalorder %s3915_s6, %s3911_s29  ;;  %p3919_p12 = scmp.lt.u32.totalorder %s3911_s29, %s4541_s20 }
 0x557   : > { %p3913_p7 = pnand %p3912_p4, %p4027_p5 }
 0x558   : > { %p3918_p11 = por %p3917_p10, %p3916_p9 }
 0x559   : > { %p3914_p8 = pneg %p3913_p7 }
 0x55a   : > { %p3920_p13 = por %p3919_p12, %p3918_p11 }
 0x55c   : > { %p3921_p0 = pnand %p3920_p13, %p3914_p8 }
 0x55e   : > { %3924 = shalt.err (!%p3921_p0)
}
 0x55f   : > { %s3962_s10 = smov 128   ;;  %s3963_s11 = smov 8  }
 0x560   : > { %3852 = dma.vmem_to_hbm [thread:$0]  (%p4027_p5), %s4536_s12, 256, %s4541_s20, %s4543_s19, %s3962_s10, %s3962_s10, %s3963_s11  }
 0x561 PF: > { %p3858_p1 = scmp.ge.s32.totalorder %s3959_s18, 2  ;;  %s2635_s7 = sand.u32 1, %s3947_s15  }
 0x562   : > { %s2636_s13 = scalar_lea.sflag [#allocation3], %s2635_s7 }
 0x563   : > { %p3855_p2 = pnand %p3858_p1, %p4031_p6 }
 0x565   : > { %3942 = dma.done.wait (!%p3855_p2), %s2636_s13, 256  }
 0x566   : > { %3944 = vsyncadd (!%p3855_p2), %s2636_s13, 4294967040  ;;  %p14_p3 = scmp.ge.s32.totalorder %s4014_s21, 4   ;;  %s4591_s15 = smov %s3951_s16 }
 0x567   : > { %s4592_s16 = smov %s3955_s17  ;;  %s4593_s17 = smov %s4025_s24 }
 0x568   : > { %s4594_s18 = smov %s4014_s21  ;;  %16 = sbr.rel (!%p14_p3) target bundleno = 3 (0x3), region = 71 }
 0x56f   :  { %2641 = vsyncpa [#allocation3], 1 }
 0x570   :  { %2643 = vsyncpa [#allocation3 + $0x1], 1 }

</bundles_post_ra>
